<compile_context>
chip_gen: v7x
topology: tpu7x:2x2x1
jax: 0.10.0
libtpu: 0.0.40
codegen_flags: <defaults>
</compile_context>

<pallas_src>
import functools

import jax
import jax.numpy as jnp
from jax import lax
from jax.experimental import pallas as pl
from jax.experimental.pallas import tpu as pltpu

BN_EPS = 1e-5
LANE = 128
M_TILE_TARGET = 4096                 # ~2 MiB f32 output tile at Pp=128; fits v5e/v6e/v7x easily
VMEM_LIMIT = 48 * 1024 * 1024        # above 16/32 MiB scoped defaults, below v7x 64 MiB physical


def _cdiv(a, b):
    return -(-a // b)


def _round_up(a, b):
    return _cdiv(a, b) * b


# ---------------------------------------------------------------------------
# Pass 1: 7x7/s2 conv tile as 7 accumulated MXU matmuls + BN partial sums
# ---------------------------------------------------------------------------
def conv_stats_kernel(p_ref, w_ref, y_ref, sum_ref, sq_ref, *, ho_valid, mask_rows):
    """p_ref  : [1, 1, TH+3, 4, Wo2, Kw]  width-packed patches, dim 3 = row_par*2 + col_par
       w_ref  : [7, Kw, Pp]               weights per ky tap (Kw = 7*Cin, Pp lane-padded)
       y_ref  : [1, TH, 2, Wo2, Pp]       raw conv tile (column-parity-major W layout)
       sum_ref, sq_ref : [1, 1, 1, Pp]    per-tile BN partial statistics
    """
    th = y_ref.shape[1]
    wo2 = y_ref.shape[3]
    pp = y_ref.shape[4]
    kw = w_ref.shape[1]
    m = th * 2 * wo2

    acc = jnp.zeros((m, pp), dtype=jnp.float32)
    for ky in range(7):  # static unroll: the height taps are free leading-dim slices
        lhs = p_ref[0, 0, pl.ds(ky // 2, th), pl.ds(2 * (ky % 2), 2)]   # [TH, 2, Wo2, Kw]
        acc = acc + jnp.dot(lhs.reshape(m, kw), w_ref[ky],
                            preferred_element_type=jnp.float32)

    y_ref[0] = acc.reshape(th, 2, wo2, pp)

    # BN partial sums over this tile (padded output columns are exact zeros by construction;
    # padded output rows -- only present when Ho was rounded up -- are masked out here).
    if mask_rows:
        row = (pl.program_id(1) * th
               + lax.broadcasted_iota(jnp.int32, (m, 1), 0) // (2 * wo2))
        stat = jnp.where(row < ho_valid, acc, 0.0)
    else:
        stat = acc
    sum_ref[0, 0] = jnp.sum(stat, axis=0, keepdims=True)
    sq_ref[0, 0] = jnp.sum(stat * stat, axis=0, keepdims=True)


# ---------------------------------------------------------------------------
# Pass 2: fused BatchNorm affine + ReLU + MaxPool2d(3, stride=2, padding=1)
# ---------------------------------------------------------------------------
def bn_relu_pool_kernel(x_ref, scale_ref, shift_ref, o_ref, *, ho_valid, wo_valid):
    """x_ref  : [1, Ho_e, 2, Wo2, Pp]  raw conv output (column-parity-major W layout)
       scale  : [1, Pp]  gamma / sqrt(var + eps);  shift : [1, Pp]  beta - mean * scale
       o_ref  : [1, Hp, Wo2, Pp]       pooled output (first ceil(Wo/2) columns are real)
    """
    ho_e = x_ref.shape[1]
    hp, wo2, pp = o_ref.shape[1], o_ref.shape[2], o_ref.shape[3]
    s = scale_ref[...]          # [1, Pp]
    b = shift_ref[...]

    # Columns that are only layout padding (conv col index = 2*wo2_idx + parity >= Wo).
    if 2 * wo2 != wo_valid:
        cpar = lax.broadcasted_iota(jnp.int32, (2, wo2, pp), 0)
        cidx = lax.broadcasted_iota(jnp.int32, (2, wo2, pp), 1)
        col_valid = (2 * cidx + cpar) < wo_valid
    else:
        col_valid = None

    def body(i, carry):
        # Pool window rows 2i-1, 2i, 2i+1; post-ReLU values are >= 0 so 0 is a safe pad value.
        r0 = x_ref[0, 2 * i]                            # [2, Wo2, Pp]
        r1 = x_ref[0, 2 * i + 1]
        rm = x_ref[0, jnp.maximum(2 * i - 1, 0)]
        a0 = jnp.maximum(r0 * s + b, 0.0)               # BN affine + ReLU
        a1 = jnp.maximum(r1 * s + b, 0.0)
        if ho_e != ho_valid:                            # Ho odd -> last conv row is padding
            a1 = jnp.where(2 * i + 1 < ho_valid, a1, 0.0)
        am = jnp.where(i > 0, jnp.maximum(rm * s + b, 0.0), 0.0)
        t = jnp.maximum(jnp.maximum(a0, a1), am)        # pooled over H, [2, Wo2, Pp]
        if col_valid is not None:
            t = jnp.where(col_valid, t, 0.0)
        te = t[0]                                       # columns 2*wp
        to = t[1]                                       # columns 2*wp + 1
        m01 = jnp.maximum(te, to)
        o_ref[0, i, 0:1] = m01[0:1]                     # wp = 0 has no left neighbour
        o_ref[0, i, 1:] = jnp.maximum(m01[1:], to[:wo2 - 1])
        return carry

    lax.fori_loop(0, hp, body, 0)


# ---------------------------------------------------------------------------
# Wrapper
# ---------------------------------------------------------------------------
def initial_block_forward(x, conv_w, gamma, beta):
    """x: [N, 3, H, W] f32 (NCHW), conv_w: [P, 3, 7, 7], gamma/beta: [P]. Returns NCHW."""
    N, Cin, H, W = x.shape
    P = conv_w.shape[0]
    KH = KW = 7
    S, PAD = 2, 3

    Ho = (H + 2 * PAD - KH) // S + 1
    Wo = (W + 2 * PAD - KW) // S + 1
    Hp = (Ho - 1) // 2 + 1              # maxpool(3, s=2, pad=1) output
    Wp = (Wo - 1) // 2 + 1

    Ho_e = 2 * Hp                       # conv rows consumed by the pool (even)
    Wo2 = _round_up(Wp, 8)              # sublane-aligned half-width (column-parity layout)
    Wo_e = 2 * Wo2
    Kw = KW * Cin                       # contraction depth per ky tap
    Pp = _round_up(max(P, LANE), LANE)  # lane-dense channel padding

    # Output-row tiling for pass 1 (grid over (sample, row tile)).
    n_t = max(1, _cdiv(Ho_e * Wo_e, M_TILE_TARGET))
    TH = _cdiv(Ho_e, n_t)
    Ho_p = TH * n_t                     # conv rows actually produced (extras are ignored)

    # ---- XLA glue on the small 3-channel input: pad + width-only packing ----------------
    Hin = 2 * (Ho + 3)                  # padded rows, as (Ho+3) even/odd row pairs
    Win = 2 * Wo + 5                    # padded cols needed by the widest tap
    xt = jnp.transpose(x, (0, 2, 3, 1)).astype(jnp.float32)                   # NHWC
    xpad = jnp.pad(xt, ((0, 0), (PAD, Hin - PAD - H), (PAD, Win - PAD - W), (0, 0)))
    taps = [xpad[:, :, kx:kx + 2 * Wo - 1:2, :] for kx in range(KW)]           # 7x[N,Hin,Wo,Cin]
    wpatch = jnp.stack(taps, axis=3).reshape(N, Hin, Wo, Kw)
    # zero-pad output columns to Wo_e (padded columns -> conv == 0 -> stats unaffected)
    wpatch = jnp.pad(wpatch, ((0, 0), (0, 0), (0, Wo_e - Wo), (0, 0)))
    # column-parity-major, then even/odd row pairs, then merge (row_par, col_par) -> 4
    wpatch = wpatch.reshape(N, Hin, Wo2, 2, Kw).transpose(0, 1, 3, 2, 4)       # [N,Hin,2,Wo2,Kw]
    wpatch = wpatch.reshape(N, Ho + 3, 2, 2, Wo2, Kw).reshape(N, Ho + 3, 4, Wo2, Kw)
    wpatch = jnp.pad(wpatch, ((0, 0), (0, Ho_p - Ho), (0, 0), (0, 0), (0, 0)))
    # per-row-tile view with a 3-pair halo (few % HBM overhead vs. ~12x full im2col)
    ptiles = jnp.stack([wpatch[:, t * TH:t * TH + TH + 3] for t in range(n_t)], axis=1)
    # ptiles: [N, n_t, TH+3, 4, Wo2, Kw]

    # weights: [P, Cin, 7, 7] -> [ky, kx*Cin + c, Pp] (lane-padded output channels)
    w3 = jnp.transpose(conv_w, (2, 3, 1, 0)).reshape(KH, Kw, P).astype(jnp.float32)
    w3 = jnp.pad(w3, ((0, 0), (0, 0), (0, Pp - P)))

    # ---- pass 1: conv + BN partial sums --------------------------------------------------
    kernel1 = functools.partial(conv_stats_kernel, ho_valid=Ho, mask_rows=bool(Ho_p > Ho))
    conv_out, sums, sqs = pl.pallas_call(
        kernel1,
        out_shape=(
            jax.ShapeDtypeStruct((N, Ho_p, 2, Wo2, Pp), jnp.float32),
            jax.ShapeDtypeStruct((N, n_t, 1, Pp), jnp.float32),
            jax.ShapeDtypeStruct((N, n_t, 1, Pp), jnp.float32),
        ),
        grid_spec=pltpu.PrefetchScalarGridSpec(
            num_scalar_prefetch=0,
            grid=(N, n_t),
            in_specs=[
                pl.BlockSpec((1, 1, TH + 3, 4, Wo2, Kw),
                             lambda n, t: (n, t, 0, 0, 0, 0)),
                pl.BlockSpec((KH, Kw, Pp), lambda n, t: (0, 0, 0)),
            ],
            out_specs=[
                pl.BlockSpec((1, TH, 2, Wo2, Pp), lambda n, t: (n, t, 0, 0, 0)),
                pl.BlockSpec((1, 1, 1, Pp), lambda n, t: (n, t, 0, 0)),
                pl.BlockSpec((1, 1, 1, Pp), lambda n, t: (n, t, 0, 0)),
            ],
        ),
        compiler_params=pltpu.CompilerParams(
            dimension_semantics=("parallel", "parallel"),
            vmem_limit_bytes=VMEM_LIMIT),
    )(ptiles, w3)

    # ---- global BN statistics (tiny [Pp] math in the wrapper) ----------------------------
    count = float(N * Ho * Wo)                       # only real output positions
    s1 = jnp.sum(sums, axis=(0, 1, 2))               # [Pp]
    s2 = jnp.sum(sqs, axis=(0, 1, 2))
    mean = s1 / count
    var = jnp.maximum(s2 / count - mean * mean, 0.0)  # biased variance (PyTorch normalization)
    gamma_p = jnp.pad(gamma.astype(jnp.float32), (0, Pp - P))
    beta_p = jnp.pad(beta.astype(jnp.float32), (0, Pp - P))
    scale = (gamma_p * lax.rsqrt(var + BN_EPS)).reshape(1, Pp)
    shift = (beta_p - mean * scale[0]).reshape(1, Pp)

    # ---- pass 2: fused BN affine + ReLU + maxpool -----------------------------------------
    kernel2 = functools.partial(bn_relu_pool_kernel, ho_valid=Ho, wo_valid=Wo)
    pooled = pl.pallas_call(
        kernel2,
        out_shape=jax.ShapeDtypeStruct((N, Hp, Wo2, Pp), jnp.float32),
        grid_spec=pltpu.PrefetchScalarGridSpec(
            num_scalar_prefetch=0,
            grid=(N,),
            in_specs=[
                pl.BlockSpec((1, Ho_e, 2, Wo2, Pp), lambda n: (n, 0, 0, 0, 0)),
                pl.BlockSpec((1, Pp), lambda n: (0, 0)),
                pl.BlockSpec((1, Pp), lambda n: (0, 0)),
            ],
            out_specs=pl.BlockSpec((1, Hp, Wo2, Pp), lambda n: (n, 0, 0, 0)),
        ),
        compiler_params=pltpu.CompilerParams(
            dimension_semantics=("parallel",),
            vmem_limit_bytes=VMEM_LIMIT),
    )(conv_out, scale, shift)

    # slice off channel / width padding, back to NCHW
    return jnp.transpose(pooled[:, :, :Wp, :P], (0, 3, 1, 2))


# ---------------------------------------------------------------------------
# Pure-JAX reference (for verification only)
# ---------------------------------------------------------------------------
def reference_forward(x, conv_w, gamma, beta):
    y = lax.conv_general_dilated(
        x, conv_w, window_strides=(2, 2), padding=[(3, 3), (3, 3)],
        dimension_numbers=("NCHW", "OIHW", "NCHW"))
    mean = jnp.mean(y, axis=(0, 2, 3), keepdims=True)
    var = jnp.mean(jnp.square(y - mean), axis=(0, 2, 3), keepdims=True)
    y = (y - mean) * lax.rsqrt(var + BN_EPS)
    y = y * gamma.reshape(1, -1, 1, 1) + beta.reshape(1, -1, 1, 1)
    y = jnp.maximum(y, 0.0)
    y = lax.reduce_window(y, -jnp.inf, lax.max,
                          window_dimensions=(1, 1, 3, 3),
                          window_strides=(1, 1, 2, 2),
                          padding=[(0, 0), (0, 0), (1, 1), (1, 1)])
    return y


if __name__ == "__main__":
    key = jax.random.PRNGKey(0)
    k_x, k_w, k_g, k_b = jax.random.split(key, 4)

    N, Cin, H, W = 2, 3, 16, 16
    init_planes = 8

    x = jax.random.normal(k_x, (N, Cin, H, W), dtype=jnp.float32)
    conv_w = 0.1 * jax.random.normal(k_w, (init_planes, Cin, 7, 7), dtype=jnp.float32)
    gamma = 1.0 + 0.1 * jax.random.normal(k_g, (init_planes,), dtype=jnp.float32)
    beta = 0.1 * jax.random.normal(k_b, (init_planes,), dtype=jnp.float32)

    out = jax.block_until_ready(initial_block_forward(x, conv_w, gamma, beta))
    ref = jax.block_until_ready(reference_forward(x, conv_w, gamma, beta))

    assert out.shape == (N, init_planes, H // 4, W // 4), out.shape
    err = float(jnp.max(jnp.abs(out - ref)))
    assert jnp.allclose(out, ref, atol=1e-3, rtol=1e-3), err

    print("KERNEL_OK")
</pallas_src>

<mosaic_0001>
module attributes {stable_mosaic.version = 11 : i64} {
  func.func @conv_stats_kernel(%arg0: i32, %arg1: i32, %arg2: memref<1x1x11x4x8x21xf32, #tpu.memory_space<vmem>>, %arg3: memref<7x21x128xf32, #tpu.memory_space<vmem>>, %arg4: memref<1x8x2x8x128xf32, #tpu.memory_space<vmem>>, %arg5: memref<1x1x1x128xf32, #tpu.memory_space<vmem>>, %arg6: memref<1x1x1x128xf32, #tpu.memory_space<vmem>>) attributes {dimension_semantics = [#tpu.dimension_semantics<parallel>, #tpu.dimension_semantics<parallel>], iteration_bounds = array<i64: 2, 1>, scalar_prefetch = 0 : i64, scratch_operands = 0 : i64, tpu.core_type = #tpu.core_type<tc>, window_params = [{transform_indices = @transform_0, window_bounds = array<i64: 1, 1, 11, 4, 8, 21>}, {pipeline_mode = #tpu.pipeline_mode<synchronous>, transform_indices = @transform_1, window_bounds = array<i64: 7, 21, 128>}, {transform_indices = @transform_2, window_bounds = array<i64: 1, 8, 2, 8, 128>}, {transform_indices = @transform_3, window_bounds = array<i64: 1, 1, 1, 128>}, {transform_indices = @transform_4, window_bounds = array<i64: 1, 1, 1, 128>}]} {
    %cst = arith.constant 0.000000e+00 : f32
    %0 = vector.broadcast %cst : f32 to vector<128x128xf32>
    %c0 = arith.constant 0 : index
    %c0_0 = arith.constant 0 : index
    %c0_1 = arith.constant 0 : index
    %c0_2 = arith.constant 0 : index
    %c0_3 = arith.constant 0 : index
    %c0_4 = arith.constant 0 : index
    %1 = vector.load %arg2[%c0, %c0_0, %c0_1, %c0_2, %c0_3, %c0_4] : memref<1x1x11x4x8x21xf32, #tpu.memory_space<vmem>>, vector<1x1x8x2x8x21xf32>
    %2 = vector.shape_cast %1 : vector<1x1x8x2x8x21xf32> to vector<8x2x8x21xf32>
    %3 = vector.shape_cast %2 : vector<8x2x8x21xf32> to vector<128x21xf32>
    %c0_5 = arith.constant 0 : index
    %c0_6 = arith.constant 0 : index
    %c0_7 = arith.constant 0 : index
    %4 = vector.load %arg3[%c0_5, %c0_6, %c0_7] : memref<7x21x128xf32, #tpu.memory_space<vmem>>, vector<1x21x128xf32>
    %5 = vector.shape_cast %4 : vector<1x21x128xf32> to vector<21x128xf32>
    %cst_8 = arith.constant dense<0.000000e+00> : vector<128x128xf32>
    %6 = tpu.matmul %3, %5, %cst_8 {dimension_numbers = #tpu.dot_dimension_numbers<[1], [0], [0], [1], [0, 0, 1, 1], [], []>} : vector<128x21xf32>, vector<21x128xf32>, vector<128x128xf32> -> vector<128x128xf32>
    %7 = arith.addf %0, %6 : vector<128x128xf32>
    %c0_9 = arith.constant 0 : index
    %c0_10 = arith.constant 0 : index
    %c0_11 = arith.constant 0 : index
    %c2 = arith.constant 2 : index
    %c0_12 = arith.constant 0 : index
    %c0_13 = arith.constant 0 : index
    %8 = vector.load %arg2[%c0_9, %c0_10, %c0_11, %c2, %c0_12, %c0_13] : memref<1x1x11x4x8x21xf32, #tpu.memory_space<vmem>>, vector<1x1x8x2x8x21xf32>
    %9 = vector.shape_cast %8 : vector<1x1x8x2x8x21xf32> to vector<8x2x8x21xf32>
    %10 = vector.shape_cast %9 : vector<8x2x8x21xf32> to vector<128x21xf32>
    %c1 = arith.constant 1 : index
    %c0_14 = arith.constant 0 : index
    %c0_15 = arith.constant 0 : index
    %11 = vector.load %arg3[%c1, %c0_14, %c0_15] : memref<7x21x128xf32, #tpu.memory_space<vmem>>, vector<1x21x128xf32>
    %12 = vector.shape_cast %11 : vector<1x21x128xf32> to vector<21x128xf32>
    %cst_16 = arith.constant dense<0.000000e+00> : vector<128x128xf32>
    %13 = tpu.matmul %10, %12, %cst_16 {dimension_numbers = #tpu.dot_dimension_numbers<[1], [0], [0], [1], [0, 0, 1, 1], [], []>} : vector<128x21xf32>, vector<21x128xf32>, vector<128x128xf32> -> vector<128x128xf32>
    %14 = arith.addf %7, %13 : vector<128x128xf32>
    %c0_17 = arith.constant 0 : index
    %c0_18 = arith.constant 0 : index
    %c1_19 = arith.constant 1 : index
    %c0_20 = arith.constant 0 : index
    %c0_21 = arith.constant 0 : index
    %c0_22 = arith.constant 0 : index
    %15 = vector.load %arg2[%c0_17, %c0_18, %c1_19, %c0_20, %c0_21, %c0_22] : memref<1x1x11x4x8x21xf32, #tpu.memory_space<vmem>>, vector<1x1x8x2x8x21xf32>
    %16 = vector.shape_cast %15 : vector<1x1x8x2x8x21xf32> to vector<8x2x8x21xf32>
    %17 = vector.shape_cast %16 : vector<8x2x8x21xf32> to vector<128x21xf32>
    %c2_23 = arith.constant 2 : index
    %c0_24 = arith.constant 0 : index
    %c0_25 = arith.constant 0 : index
    %18 = vector.load %arg3[%c2_23, %c0_24, %c0_25] : memref<7x21x128xf32, #tpu.memory_space<vmem>>, vector<1x21x128xf32>
    %19 = vector.shape_cast %18 : vector<1x21x128xf32> to vector<21x128xf32>
    %cst_26 = arith.constant dense<0.000000e+00> : vector<128x128xf32>
    %20 = tpu.matmul %17, %19, %cst_26 {dimension_numbers = #tpu.dot_dimension_numbers<[1], [0], [0], [1], [0, 0, 1, 1], [], []>} : vector<128x21xf32>, vector<21x128xf32>, vector<128x128xf32> -> vector<128x128xf32>
    %21 = arith.addf %14, %20 : vector<128x128xf32>
    %c0_27 = arith.constant 0 : index
    %c0_28 = arith.constant 0 : index
    %c1_29 = arith.constant 1 : index
    %c2_30 = arith.constant 2 : index
    %c0_31 = arith.constant 0 : index
    %c0_32 = arith.constant 0 : index
    %22 = vector.load %arg2[%c0_27, %c0_28, %c1_29, %c2_30, %c0_31, %c0_32] : memref<1x1x11x4x8x21xf32, #tpu.memory_space<vmem>>, vector<1x1x8x2x8x21xf32>
    %23 = vector.shape_cast %22 : vector<1x1x8x2x8x21xf32> to vector<8x2x8x21xf32>
    %24 = vector.shape_cast %23 : vector<8x2x8x21xf32> to vector<128x21xf32>
    %c3 = arith.constant 3 : index
    %c0_33 = arith.constant 0 : index
    %c0_34 = arith.constant 0 : index
    %25 = vector.load %arg3[%c3, %c0_33, %c0_34] : memref<7x21x128xf32, #tpu.memory_space<vmem>>, vector<1x21x128xf32>
    %26 = vector.shape_cast %25 : vector<1x21x128xf32> to vector<21x128xf32>
    %cst_35 = arith.constant dense<0.000000e+00> : vector<128x128xf32>
    %27 = tpu.matmul %24, %26, %cst_35 {dimension_numbers = #tpu.dot_dimension_numbers<[1], [0], [0], [1], [0, 0, 1, 1], [], []>} : vector<128x21xf32>, vector<21x128xf32>, vector<128x128xf32> -> vector<128x128xf32>
    %28 = arith.addf %21, %27 : vector<128x128xf32>
    %c0_36 = arith.constant 0 : index
    %c0_37 = arith.constant 0 : index
    %c2_38 = arith.constant 2 : index
    %c0_39 = arith.constant 0 : index
    %c0_40 = arith.constant 0 : index
    %c0_41 = arith.constant 0 : index
    %29 = vector.load %arg2[%c0_36, %c0_37, %c2_38, %c0_39, %c0_40, %c0_41] : memref<1x1x11x4x8x21xf32, #tpu.memory_space<vmem>>, vector<1x1x8x2x8x21xf32>
    %30 = vector.shape_cast %29 : vector<1x1x8x2x8x21xf32> to vector<8x2x8x21xf32>
    %31 = vector.shape_cast %30 : vector<8x2x8x21xf32> to vector<128x21xf32>
    %c4 = arith.constant 4 : index
    %c0_42 = arith.constant 0 : index
    %c0_43 = arith.constant 0 : index
    %32 = vector.load %arg3[%c4, %c0_42, %c0_43] : memref<7x21x128xf32, #tpu.memory_space<vmem>>, vector<1x21x128xf32>
    %33 = vector.shape_cast %32 : vector<1x21x128xf32> to vector<21x128xf32>
    %cst_44 = arith.constant dense<0.000000e+00> : vector<128x128xf32>
    %34 = tpu.matmul %31, %33, %cst_44 {dimension_numbers = #tpu.dot_dimension_numbers<[1], [0], [0], [1], [0, 0, 1, 1], [], []>} : vector<128x21xf32>, vector<21x128xf32>, vector<128x128xf32> -> vector<128x128xf32>
    %35 = arith.addf %28, %34 : vector<128x128xf32>
    %c0_45 = arith.constant 0 : index
    %c0_46 = arith.constant 0 : index
    %c2_47 = arith.constant 2 : index
    %c2_48 = arith.constant 2 : index
    %c0_49 = arith.constant 0 : index
    %c0_50 = arith.constant 0 : index
    %36 = vector.load %arg2[%c0_45, %c0_46, %c2_47, %c2_48, %c0_49, %c0_50] : memref<1x1x11x4x8x21xf32, #tpu.memory_space<vmem>>, vector<1x1x8x2x8x21xf32>
    %37 = vector.shape_cast %36 : vector<1x1x8x2x8x21xf32> to vector<8x2x8x21xf32>
    %38 = vector.shape_cast %37 : vector<8x2x8x21xf32> to vector<128x21xf32>
    %c5 = arith.constant 5 : index
    %c0_51 = arith.constant 0 : index
    %c0_52 = arith.constant 0 : index
    %39 = vector.load %arg3[%c5, %c0_51, %c0_52] : memref<7x21x128xf32, #tpu.memory_space<vmem>>, vector<1x21x128xf32>
    %40 = vector.shape_cast %39 : vector<1x21x128xf32> to vector<21x128xf32>
    %cst_53 = arith.constant dense<0.000000e+00> : vector<128x128xf32>
    %41 = tpu.matmul %38, %40, %cst_53 {dimension_numbers = #tpu.dot_dimension_numbers<[1], [0], [0], [1], [0, 0, 1, 1], [], []>} : vector<128x21xf32>, vector<21x128xf32>, vector<128x128xf32> -> vector<128x128xf32>
    %42 = arith.addf %35, %41 : vector<128x128xf32>
    %c0_54 = arith.constant 0 : index
    %c0_55 = arith.constant 0 : index
    %c3_56 = arith.constant 3 : index
    %c0_57 = arith.constant 0 : index
    %c0_58 = arith.constant 0 : index
    %c0_59 = arith.constant 0 : index
    %43 = vector.load %arg2[%c0_54, %c0_55, %c3_56, %c0_57, %c0_58, %c0_59] : memref<1x1x11x4x8x21xf32, #tpu.memory_space<vmem>>, vector<1x1x8x2x8x21xf32>
    %44 = vector.shape_cast %43 : vector<1x1x8x2x8x21xf32> to vector<8x2x8x21xf32>
    %45 = vector.shape_cast %44 : vector<8x2x8x21xf32> to vector<128x21xf32>
    %c6 = arith.constant 6 : index
    %c0_60 = arith.constant 0 : index
    %c0_61 = arith.constant 0 : index
    %46 = vector.load %arg3[%c6, %c0_60, %c0_61] : memref<7x21x128xf32, #tpu.memory_space<vmem>>, vector<1x21x128xf32>
    %47 = vector.shape_cast %46 : vector<1x21x128xf32> to vector<21x128xf32>
    %cst_62 = arith.constant dense<0.000000e+00> : vector<128x128xf32>
    %48 = tpu.matmul %45, %47, %cst_62 {dimension_numbers = #tpu.dot_dimension_numbers<[1], [0], [0], [1], [0, 0, 1, 1], [], []>} : vector<128x21xf32>, vector<21x128xf32>, vector<128x128xf32> -> vector<128x128xf32>
    %49 = arith.addf %42, %48 : vector<128x128xf32>
    %50 = vector.shape_cast %49 : vector<128x128xf32> to vector<8x2x8x128xf32>
    %c0_63 = arith.constant 0 : index
    %c0_64 = arith.constant 0 : index
    %c0_65 = arith.constant 0 : index
    %c0_66 = arith.constant 0 : index
    %c0_67 = arith.constant 0 : index
    %51 = vector.load %arg4[%c0_63, %c0_64, %c0_65, %c0_66, %c0_67] : memref<1x8x2x8x128xf32, #tpu.memory_space<vmem>>, vector<1x8x2x8x128xf32>
    %52 = vector.shape_cast %51 : vector<1x8x2x8x128xf32> to vector<8x2x8x128xf32>
    %53 = vector.shape_cast %50 : vector<8x2x8x128xf32> to vector<1x8x2x8x128xf32>
    tpu.vector_store %arg4[%c0_63, %c0_64, %c0_65, %c0_66, %c0_67], %53 {strides = array<i32>} : memref<1x8x2x8x128xf32, #tpu.memory_space<vmem>>, vector<1x8x2x8x128xf32>,
    %cst_68 = arith.constant dense<0.000000e+00> : vector<128xf32>
    %54 = vector.multi_reduction <add>, %49, %cst_68 [0] : vector<128x128xf32> to vector<128xf32>
    %55 = vector.shape_cast %54 : vector<128xf32> to vector<1x128xf32>
    %c0_69 = arith.constant 0 : index
    %c0_70 = arith.constant 0 : index
    %c0_71 = arith.constant 0 : index
    %c0_72 = arith.constant 0 : index
    %56 = vector.load %arg5[%c0_69, %c0_70, %c0_71, %c0_72] : memref<1x1x1x128xf32, #tpu.memory_space<vmem>>, vector<1x1x1x128xf32>
    %57 = vector.shape_cast %56 : vector<1x1x1x128xf32> to vector<1x128xf32>
    %58 = vector.shape_cast %55 : vector<1x128xf32> to vector<1x1x1x128xf32>
    tpu.vector_store %arg5[%c0_69, %c0_70, %c0_71, %c0_72], %58 {strides = array<i32>} : memref<1x1x1x128xf32, #tpu.memory_space<vmem>>, vector<1x1x1x128xf32>,
    %59 = arith.mulf %49, %49 : vector<128x128xf32>
    %cst_73 = arith.constant dense<0.000000e+00> : vector<128xf32>
    %60 = vector.multi_reduction <add>, %59, %cst_73 [0] : vector<128x128xf32> to vector<128xf32>
    %61 = vector.shape_cast %60 : vector<128xf32> to vector<1x128xf32>
    %c0_74 = arith.constant 0 : index
    %c0_75 = arith.constant 0 : index
    %c0_76 = arith.constant 0 : index
    %c0_77 = arith.constant 0 : index
    %62 = vector.load %arg6[%c0_74, %c0_75, %c0_76, %c0_77] : memref<1x1x1x128xf32, #tpu.memory_space<vmem>>, vector<1x1x1x128xf32>
    %63 = vector.shape_cast %62 : vector<1x1x1x128xf32> to vector<1x128xf32>
    %64 = vector.shape_cast %61 : vector<1x128xf32> to vector<1x1x1x128xf32>
    tpu.vector_store %arg6[%c0_74, %c0_75, %c0_76, %c0_77], %64 {strides = array<i32>} : memref<1x1x1x128xf32, #tpu.memory_space<vmem>>, vector<1x1x1x128xf32>,
    return
  }
  func.func @transform_0(%arg0: i32, %arg1: i32) -> (i32, i32, i32, i32, i32, i32) {
    %c0_i32 = arith.constant 0 : i32
    %c0_i32_0 = arith.constant 0 : i32
    %c0_i32_1 = arith.constant 0 : i32
    %c0_i32_2 = arith.constant 0 : i32
    %c0_i32_3 = arith.constant 0 : i32
    return %arg0, %arg1, %c0_i32, %c0_i32_0, %c0_i32_1, %c0_i32_2 : i32, i32, i32, i32, i32, i32
  }
  func.func @transform_1(%arg0: i32, %arg1: i32) -> (i32, i32, i32) {
    %c0_i32 = arith.constant 0 : i32
    %c0_i32_0 = arith.constant 0 : i32
    %c0_i32_1 = arith.constant 0 : i32
    %c0_i32_2 = arith.constant 0 : i32
    return %c0_i32, %c0_i32_0, %c0_i32_1 : i32, i32, i32
  }
  func.func @transform_2(%arg0: i32, %arg1: i32) -> (i32, i32, i32, i32, i32) {
    %c0_i32 = arith.constant 0 : i32
    %c0_i32_0 = arith.constant 0 : i32
    %c0_i32_1 = arith.constant 0 : i32
    %c0_i32_2 = arith.constant 0 : i32
    return %arg0, %arg1, %c0_i32, %c0_i32_0, %c0_i32_1 : i32, i32, i32, i32, i32
  }
  func.func @transform_3(%arg0: i32, %arg1: i32) -> (i32, i32, i32, i32) {
    %c0_i32 = arith.constant 0 : i32
    %c0_i32_0 = arith.constant 0 : i32
    %c0_i32_1 = arith.constant 0 : i32
    return %arg0, %arg1, %c0_i32, %c0_i32_0 : i32, i32, i32, i32
  }
  func.func @transform_4(%arg0: i32, %arg1: i32) -> (i32, i32, i32, i32) {
    %c0_i32 = arith.constant 0 : i32
    %c0_i32_0 = arith.constant 0 : i32
    %c0_i32_1 = arith.constant 0 : i32
    return %arg0, %arg1, %c0_i32, %c0_i32_0 : i32, i32, i32, i32
  }
}

</mosaic_0001>

<bundles_post_ra>
// kernel: tpu_custom_call.1
= control target key start
LH: loop header
LB: loop body
LE: loop exit
PB: predicated region body
PF: predicated region fallthrough
CT: control target
= control target key end

     0   :  { %10 = vsyncpa [#allocation3], 0  ;;  %s3822_s0 = inlined_call_operand.hbm [shape: f32[2,1,11,4,8,21], index: 0, kind: input, shape index: {}]   ;;  %s3823_s1 = inlined_call_operand.hbm [shape: f32[7,21,128], index: 1, kind: input, shape index: {}]   ;;  %s3824_s2 = inlined_call_operand.hbm [shape: f32[2,8,2,8,128], index: 2, kind: output, shape index: {0}]   ;;  %s3825_s3 = inlined_call_operand.hbm [shape: f32[2,1,1,128], index: 3, kind: output, shape index: {1}]   ;;  %s3826_s4 = inlined_call_operand.hbm [shape: f32[2,1,1,128], index: 4, kind: output, shape index: {2}]  }
   0x1   :  { %12 = vsyncpa [#allocation3 + $0x1], 0 }
   0x2   :  { %13 = vsyncpa [#allocation6], 0 }
   0x3   :  { %14 = vsyncpa [#allocation4], 0 }
   0x4   :  { %16 = vsyncpa [#allocation4 + $0x1], 0 }
   0x5   :  { %17 = vsyncpa [#allocation9], 0 }
   0x6   :  { %19 = vsyncpa [#allocation9 + $0x1], 0  ;;  %s3183_s15 = smov 0   ;;  %s3185_s16 = smov 0  }
   0x7   :  { %s3187_s17 = smov 0   ;;  %s3189_s18 = smov 0  }
   0x8   :  { %s3191_s19 = smov 0   ;;  %s3193_s20 = smov 0  }
   0x9 LB: > { %s3214_s21 = sadd.s32 4294967295, %s3147_s20   ;;  %s3830_s22 = sadd.s32 4294967294, %s3147_s20   ;;  %s3147_s20 = sphi %s3193_s20, %s25_s20   ;;  %s3143_s19 = sphi %s3191_s19, %s3849_s19   ;;  %s3139_s18 = sphi %s3189_s18, %s3848_s18   ;;  %s3135_s17 = sphi %s3187_s17, %s3847_s17   ;;  %s3131_s16 = sphi %s3185_s16, %s3846_s16   ;;  %s3127_s15 = sphi %s3183_s15, %s3845_s15  }
   0xa   : > { %p59_p0 = scmp.ne.s32.totalorder %s3131_s16, %s3127_s15  ;;  %p3827_p1 = scmp.eq.s32.totalorder %s3214_s21, 0 }
   0xb   : > { %p112_p3 = scmp.eq.s32.totalorder %s3830_s22, 1  ;;  %p2152_p5 = scmp.ge.s32.totalorder %s3147_s20, 1 }
   0xc   : > { %p3225_p4 = por %p3827_p1, %p59_p0  ;;  %p175_p7 = scmp.lt.s32.totalorder %s3147_s20, 3 }
   0xd   : > { %p3230_p6 = por %p112_p3, %p59_p0  ;;  %s3149_s26 = smov [#allocation5]  }
   0xe   : > { %s3831_s23 = scalar_select %p3225_p4, 1, 0 }
   0xf   : > { %s3832_s24 = scalar_select %p3230_p6, 1, 0 }
  0x10   : > { %p3235_p8 = pnand %p2152_p5, %p175_p7  ;;  %s187_s27 = sshll.u32 %s3149_s26, 4  ;;  %s188_s27 = int_to_ptr.vmem [resolvable:$true] %s187_s27 }
  0x11   : > { %s37_s29 = sadd.s32 1, %s3143_s19  ;;  %s2943_s6 = scalar_lea.hbm %s3823_s1, 2688 }
  0x12   : > { %s3833_s25 = scalar_select %p3235_p8, 1, 0 }
  0x13   : > { %p2868_p9 = pneg %p3235_p8  ;;  %p2944_p12 = scmp.ne.s32.totalorder %s3823_s1, %s2943_s6 }
  0x14   : > { %p2950_p5 = scmp.lt.u32.totalorder %s2943_s6, %s3823_s1 }
  0x15   : > { %p3244_p11 = pnand %p2868_p9, %p3827_p1 }
  0x17   : > { %p2945_p13 = pneg %p3244_p11 }
  0x19   : > { %p2946_p0 = pnand %p2945_p13, %p2944_p12 }
  0x1b   : > { %p2947_p3 = pneg %p2946_p0 }
  0x1d   : > { %p2952_p7 = pnand %p2950_p5, %p2947_p3 }
  0x1f   : > { %2955 = shalt.err (!%p2952_p7)
}
  0x20   : > { %s2956_s11 = scalar_lea.vmem %s188_s27, 2688  ;;  %p2964_p2 = scmp.lt.s32.totalorder %s188_s27, %s188_s27 }
  0x21   : > { %p2957_p9 = scmp.ne.s32.totalorder %s188_s27, %s2956_s11  ;;  %p2965_p6 = scmp.lt.s32.totalorder %s2956_s11, %s2956_s11 }
  0x23   : > { %p2959_p10 = pnand %p2957_p9, %p2945_p13  ;;  %p2966_p4 = por %p2965_p6, %p2964_p2 }
  0x25   : > { %p2960_p1 = pneg %p2959_p10 }
  0x27   : > { %p2967_p8 = pnand %p2966_p4, %p2960_p1 }
  0x29   : > { %2970 = shalt.err (!%p2967_p8)
}
  0x2a   : > { %s3150_s12 = smov 128   ;;  %s3151_s13 = smov 8  }
  0x2b   : > { %2871 = dma.hbm_to_vmem [thread:$0]  (!%p3244_p11), %s3823_s1, 2688, %s188_s27, [#allocation6], %s3150_s12, %s3150_s12, %s3151_s13  }
  0x2c   : > { %p39_p1 = scmp.ge.s32.totalorder %s37_s29, 2  ;;  %s46_s30 = sadd.s32 1, %s3135_s17 }
  0x2d   : > { %p53_p2 = scmp.ne.s32.totalorder %s3135_s17, %s3131_s16  ;;  %p54_p4 = scmp.eq.s32.totalorder %s3147_s20, 0 }
  0x2e   : > { %s3851_s29 = smov (%p39_p1, %s37_s29), 0  ;;  %p3835_p8 = scmp.eq.s32.totalorder %s3214_s21, 1 }
  0x2f   : > { %p55_p6 = por %p54_p4, %p53_p2  ;;  %s41_s28 = ssub.s32 %s3143_s19, %s3851_s29 }
  0x30   : > { %p3276_p10 = por %p3835_p8, %p53_p2  ;;  %p2887_p12 = scmp.lt.s32.totalorder %s3147_s20, 2 }
  0x31   : > { %p44_p13 = scmp.eq.s32.totalorder %s41_s28, 0  ;;  %s201_s6 = sand.u32 1, %s3135_s17  }
  0x32   : > { %s2853_s7 = smul.u32 352, %s201_s6  ;;  %p3288_p11 = pnand %p2887_p12, %p55_p6 }
  0x33   : > { %s3285_s8 = scalar_select %p44_p13, %s3135_s17, %s46_s30  }
  0x34   : > { %s2854_s27 = smul.u32 5632, %s3143_s19  ;;  %s205_s9 = scalar_lea.vmem [#allocation2], %s2853_s7 }
  0x35   : > { %s214_s10 = sshll.u32 %s205_s9, 4  ;;  %s3299_s30 = scalar_lea.sflag [#allocation3], %s201_s6  ;;  %s3297_s10 = int_to_ptr.vmem [resolvable:$true] %s214_s10 }
  0x36   : > { %s3295_s22 = scalar_lea.hbm %s3822_s0, %s2854_s27  ;;  %p2973_p3 = pneg %p3288_p11 }
  0x37   : > { %s2971_s28 = scalar_lea.hbm %s3295_s22, 5632  ;;  %s2976_s27 = scalar_lea.hbm %s3822_s0, 11264 }
  0x38   : > { %p2972_p0 = scmp.ne.s32.totalorder %s3295_s22, %s2971_s28  ;;  %p2977_p9 = scmp.lt.u32.totalorder %s3295_s22, %s3822_s0 }
  0x39   : > { %p2978_p1 = scmp.lt.u32.totalorder %s2976_s27, %s2971_s28  ;;  %p2980_p4 = scmp.lt.u32.totalorder %s2971_s28, %s3295_s22 }
  0x3a   : > { %p2974_p5 = pnand %p2973_p3, %p2972_p0 }
  0x3b   : > { %p2979_p2 = por %p2978_p1, %p2977_p9 }
  0x3c   : > { %p2975_p7 = pneg %p2974_p5 }
  0x3d   : > { %p2981_p6 = por %p2980_p4, %p2979_p2 }
  0x3f   : > { %p2982_p8 = pnand %p2981_p6, %p2975_p7 }
  0x41   : > { %2985 = shalt.err (!%p2982_p8)
}
  0x42   : > { %s2986_s6 = scalar_lea.vmem %s3297_s10, 5632  ;;  %s3152_s7 = smov [#allocation2]  }
  0x43   : > { %p2987_p12 = scmp.ne.s32.totalorder %s3297_s10, %s2986_s6  ;;  %s2991_s9 = sshll.u32 %s3152_s7, 4  ;;  %s2992_s9 = int_to_ptr.vmem [resolvable:$false] %s2991_s9 }
  0x44   : > { %s2993_s14 = scalar_lea.vmem %s2992_s9, 11264  ;;  %p2994_p5 = scmp.lt.s32.totalorder %s3297_s10, %s2992_s9 }
  0x45   : > { %p2989_p13 = pnand %p2987_p12, %p2973_p3  ;;  %p2995_p9 = scmp.lt.s32.totalorder %s2993_s14, %s2986_s6 }
  0x47   : > { %p2990_p0 = pneg %p2989_p13  ;;  %p2996_p1 = por %p2995_p9, %p2994_p5 }
  0x49   : > { %p2997_p2 = pnand %p2996_p1, %p2990_p0 }
  0x4b   : > { %3000 = shalt.err (!%p2997_p2)
}
  0x4c   : > { %2875 = dma.hbm_to_vmem [thread:$0]  (!%p3288_p11), %s3295_s22, 5632, %s3297_s10, %s3299_s30, %s3150_s12, %s3150_s12, %s3151_s13  }
  0x4d   : > { %p3838_p3 = scmp.ne.s32.totalorder %s3833_s25, 0 }
  0x4e   : > { %s3333_s28 = sand.u32 (!%p3838_p3), 1, %s3131_s16   ;;  %p3839_p7 = scmp.ne.s32.totalorder (!%p3838_p3), %s3831_s23, 0 }
  0x4f   : > { %226 = sbr.rel (%p3838_p3) target bundleno = 487 (0x1e7), region = 28  ;;  %s229_s26 = scalar_lea.sflag (!%p3838_p3), [#allocation3], %s3333_s28 }
  0x50   : > { %s2855_s27 = smul.u32 (!%p3838_p3), 352, %s3333_s28 }
  0x52   : > { %s3337_s6 = scalar_lea.vmem (!%p3838_p3), [#allocation2], %s2855_s27 }
  0x56   : > { %3110 = dma.done.wait (%p3839_p7), %s229_s26, 5632  }
  0x57   : > { %3112 = vsyncadd (%p3839_p7), %s229_s26, 4294961664  ;;  %p3840_p11 = scmp.eq.s32.totalorder %s3214_s21, 0 }
  0x59   : > { %3114 = dma.done.wait (%p3840_p11), [#allocation6], 2688   ;;  %p3841_p4 = pmov %p3840_p11 }
  0x5a   : > { %v307_v0 = vld [vmem:[#allocation5 + $0x18] sm:$0xff]  ;;  %v308_v1 = vld [vmem:[#allocation5 + $0x20] sm:$0xff]  ;;  %v955_v2 = vld [vmem:[#allocation5 + $0x48] sm:$0xff]  ;;  %vm310_vm0 = vcmask 171008   ;;  %vm359_vm1 = vcmask 1044480   ;;  %s2158_s22 = sshll.u32 %s3333_s28, 7 }
  0x5b   : > { %3116 = vsyncadd (%p3841_p4), [#allocation6], 4294964608  ;;  %v2725_v3 = vpack.c.bf16 %v308_v1, %v307_v0  ;;  %v956_v4 = vld [vmem:[#allocation5 + $0x50] sm:$0xff]  ;;  %v309_v6 = vld [vmem:[#allocation5 + $0x28] sm:$0x1f]  ;;  %s3678_s23 = scalar_lea.vmem [#allocation7], %s2158_s22 }
  0x5c   : > { %v3347_v5 = vpack.c.bf16 %v956_v4, %v955_v2  ;;  %v3349_v7 = vld [vmem:[#allocation5 + $0x58] sm:$0x1f]  ;;  %v2159_v8 = vld [vmem:[%s3337_s6 + $0x10] sm:$0xff]  ;;  %v286_v10 = vld [vmem:[#allocation5] sm:$0xff]  ;;  %s2381_s25 = sshll.u32 %s3139_s18, 11  ;;  %s1970_s12 = sshll.u32 %s3678_s23, 4  ;;  %s3701_s12 = int_to_ptr.vmem [resolvable:$true] %s1970_s12 }
  0x5d   : > { %2726 = vmatprep.subr.bf16.mxu1 %v2725_v3  ;;  %2521 = vmatprep.mubr.msk.f32.mxu1 %vm310_vm0, %v2159_v8  ;;  %v2242_v9 = vld [vmem:[%s3337_s6 + $0x30] sm:$0xff]  ;;  %v287_v11 = vld [vmem:[#allocation5 + $0x8] sm:$0xff]  ;;  %v1188_v12 = vld [vmem:[#allocation5 + $0x60] sm:$0xff]  ;;  %s3699_s11 = scalar_lea.hbm %s3824_s2, %s2381_s25  ;;  %s1946_s30 = scalar_lea.sflag [#allocation4], %s3333_s28 }
  0x5e   : > { %2738 = vmatprep.subr.bf16.mxu0 %v3347_v5  ;;  %2728 = vmatpush3.bf16.msra.mxu1 %v2725_v3  ;;  %v1189_v13 = vld [vmem:[#allocation5 + $0x68] sm:$0xff]  ;;  %v2160_v14 = vld [vmem:[%s3337_s6 + $0x18] sm:$0xff]  ;;  %v2729_v15 = vpack.c.bf16 %v287_v11, %v286_v10  ;;  %v3368_v18 = vld [vmem:[%s3337_s6 + $0x50] sm:$0xff]  ;;  %s3001_s7 = scalar_lea.vmem %s3701_s12, 2048  ;;  %s3153_s9 = smov [#allocation7]  }
  0x5f   : > { %2740 = vmatpush3.bf16.msra.mxu0 %v3347_v5  ;;  %2519 = vmatprep.subr.msk.mxu1 %vm359_vm1, %v309_v6  ;;  %v2243_v16 = vld [vmem:[%s3337_s6 + $0x38] sm:$0xff]  ;;  %v2741_v17 = vpack.c.bf16 %v1189_v13, %v1188_v12  ;;  %v1422_v20 = vld [vmem:[#allocation5 + $0x80] sm:$0xff]  ;;  %v3375_v22 = vld [vmem:[%s3337_s6 + $0x70] sm:$0xff]  ;;  %p3002_p6 = scmp.ne.s32.totalorder %s3701_s12, %s3001_s7  ;;  %s3005_s14 = sshll.u32 %s3153_s9, 4  ;;  %s3006_s14 = int_to_ptr.vmem [resolvable:$false] %s3005_s14 }
  0x60   : > { %2609 = vmatprep.subr.msk.mxu0 %vm359_vm1, %v3349_v7  ;;  %2611 = vmatprep.mubr.msk.f32.mxu0 %vm310_vm0, %v2242_v9  ;;  %v1421_v19 = vld [vmem:[#allocation5 + $0x78] sm:$0xff]  ;;  %v1190_v23 = vld [vmem:[#allocation5 + $0x70] sm:$0x1f]  ;;  %v3408_v32 = vld [vmem:[%s3337_s6 + $0x40] sm:$0xff]  ;;  %s3007_s27 = scalar_lea.vmem %s3006_s14, 4096  ;;  %p3008_p13 = scmp.lt.s32.totalorder %s3701_s12, %s3006_s14 }
  0x61   : > { %v3371_v21 = vld [vmem:[%s3337_s6 + $0x58] sm:$0xff]  ;;  %v288_v24 = vld [vmem:[#allocation5 + $0x10] sm:$0x1f]  ;;  %v2745_v25 = vpack.c.bf16 %v1422_v20, %v1421_v19  ;;  %v3419_v33 = vld [vmem:[%s3337_s6 + $0x48] sm:$0xff]  ;;  %p3003_p8 = pnand %p3002_p6, %p3276_p10  ;;  %p3009_p0 = scmp.lt.s32.totalorder %s3007_s27, %s3001_s7 }
  0x62   : > { %2520 = vmatpush3.msk.msra.mxu1 %vm359_vm1, %v309_v6  ;;  %v722_v26 = vld [vmem:[#allocation5 + $0x30] sm:$0xff]  ;;  %v723_v27 = vld [vmem:[#allocation5 + $0x38] sm:$0xff]  ;;  %v3425_v35 = vld [vmem:[%s3337_s6 + $0x60] sm:$0xff] }
  0x63   : > { %2610 = vmatpush3.msk.msra.mxu0 %vm359_vm1, %v3349_v7  ;;  %2522 = vmatmul.mubr.msk.f32.vlgmr.msra.gmra.mrb[0].mxu1 %vm310_vm0, %v2160_v14  ;;  %v3387_v28 = vld [vmem:[%s3337_s6 + $0x78] sm:$0xff]  ;;  %v3392_v29 = vld [vmem:[%s3337_s6 + $0x90] sm:$0xff]  ;;  %v2733_v30 = vpack.c.bf16 %v723_v27, %v722_v26  ;;  %v1423_v36 = vld [vmem:[#allocation5 + $0x88] sm:$0x1f]  ;;  %p3004_p12 = pneg %p3003_p8  ;;  %p3010_p5 = por %p3009_p0, %p3008_p13 }
  0x64   : > { %2730 = vmatprep.subr.bf16.mxu1 %v2729_v15  ;;  %2612 = vmatmul.mubr.msk.f32.vlgmr.msra.gmra.mrb[0].mxu0 %vm310_vm0, %v2243_v16  ;;  %v3404_v31 = vld [vmem:[%s3337_s6 + $0x98] sm:$0xff]  ;;  %v3422_v34 = vld [vmem:[%s3337_s6 + $0xb0] sm:$0xff]  ;;  %v3439_v40 = vld [vmem:[%s3337_s6 + $0x68] sm:$0xff] }
  0x65   : > { %2742 = vmatprep.subr.bf16.mxu0 %v2741_v17  ;;  %2732 = vmatpush3.bf16.msra.mxu1 %v2729_v15  ;;  %v1654_v37 = vld [vmem:[#allocation5 + $0x90] sm:$0xff]  ;;  %v1655_v38 = vld [vmem:[#allocation5 + $0x98] sm:$0xff]  ;;  %v3445_v42 = vld [vmem:[%s3337_s6 + $0x80] sm:$0xff]  ;;  %p3011_p9 = pnand %p3010_p5, %p3004_p12 }
  0x66   : > { %2744 = vmatpush3.bf16.msra.mxu0 %v2741_v17  ;;  %2524 = vmatprep.mubr.msk.f32.mxu1 %vm310_vm0, %v2242_v9  ;;  %v3434_v39 = vld [vmem:[%s3337_s6 + $0xb8] sm:$0xff]  ;;  %v3442_v41 = vld [vmem:[%s3337_s6 + $0xd0] sm:$0xff]  ;;  %v2749_v43 = vpack.c.bf16 %v1655_v38, %v1654_v37  ;;  %v3460_v45 = vld [vmem:[%s3337_s6 + $0x88] sm:$0xff] }
  0x67   : > { %2614 = vmatprep.mubr.msk.f32.mxu0 %vm310_vm0, %v3368_v18  ;;  %2525 = vmatmul.mubr.msk.f32.gmra.mrb[2].mxu1 %vm310_vm0, %v2243_v16  ;;  %v3455_v44 = vld [vmem:[%s3337_s6 + $0xd8] sm:$0xff]  ;;  %v3463_v46 = vld [vmem:[%s3337_s6 + $0xf0] sm:$0xff]  ;;  %v3467_v47 = vld [vmem:[%s3337_s6 + $0xa0] sm:$0xff] }
  0x68   : > { %2615 = vmatmul.mubr.msk.f32.gmra.mrb[2].mxu0 %vm310_vm0, %v3371_v21  ;;  %2527 = vmatprep.mubr.msk.f32.mxu1 %vm310_vm0, %v3368_v18  ;;  %v3476_v48 = vld [vmem:[%s3337_s6 + $0xf8] sm:$0xff]  ;;  %v3481_v49 = vld [vmem:[%s3337_s6 + $0xa8] sm:$0xff]  ;;  %v270_v50 = vld [vmem:[%s3337_s6] sm:$0xff] }
  0x69   : > { %2617 = vmatprep.mubr.msk.f32.mxu0 %vm310_vm0, %v3375_v22  ;;  %2639 = vmatprep.subr.msk.mxu0 %vm359_vm1, %v1190_v23  ;;  %v3485_v51 = vld [vmem:[%s3337_s6 + $0xc0] sm:$0xff]  ;;  %v271_v52 = vld [vmem:[%s3337_s6 + $0x8] sm:$0xff]  ;;  %v2320_v0 = vld [vmem:[%s3337_s6 + $0x110] sm:$0xff] }
  0x6a   : > { %2640 = vmatpush3.msk.msra.mxu0 %vm359_vm1, %v1190_v23  ;;  %2549 = vmatprep.subr.msk.mxu1 %vm359_vm1, %v288_v24  ;;  %v3496_v53 = vld [vmem:[%s3337_s6 + $0xc8] sm:$0xff]  ;;  %v272_v54 = vld [vmem:[%s3337_s6 + $0x20] sm:$0xff]  ;;  %v2321_v1 = vld [vmem:[%s3337_s6 + $0x118] sm:$0xff] }
  0x6b   : > { %2528 = vmatmul.mubr.msk.f32.gmra.mrb[4].mxu1 %vm310_vm0, %v3371_v21  ;;  %2746 = vmatprep.subr.bf16.mxu0 %v2745_v25  ;;  %v3500_v55 = vld [vmem:[%s3337_s6 + $0xe0] sm:$0xff]  ;;  %v273_v57 = vld [vmem:[%s3337_s6 + $0x28] sm:$0xff]  ;;  %v2322_v2 = vld [vmem:[%s3337_s6 + $0x130] sm:$0xff] }
  0x6c   : > { %2618 = vmatmul.mubr.msk.f32.gmra.mrb[4].mxu0 %vm310_vm0, %v3387_v28  ;;  %2530 = vmatprep.mubr.msk.f32.mxu1 %vm310_vm0, %v3375_v22  ;;  %v724_v56 = vld [vmem:[#allocation5 + $0x40] sm:$0x1f]  ;;  %v3510_v58 = vld [vmem:[%s3337_s6 + $0xe8] sm:$0xff]  ;;  %v2323_v3 = vld [vmem:[%s3337_s6 + $0x138] sm:$0xff] }
  0x6d   : > { %2620 = vmatprep.mubr.msk.f32.mxu0 %vm310_vm0, %v3392_v29  ;;  %2550 = vmatpush3.msk.msra.mxu1 %vm359_vm1, %v288_v24  ;;  %v3513_v59 = vld [vmem:[%s3337_s6 + $0x100] sm:$0xff]  ;;  %v3524_v60 = vld [vmem:[%s3337_s6 + $0x108] sm:$0xff] }
  0x6e   : > { %2734 = vmatprep.subr.bf16.mxu1 %v2733_v30  ;;  %v3528_v61 = vld [vmem:[%s3337_s6 + $0x120] sm:$0xff]  ;;  %v3540_v62 = vld [vmem:[%s3337_s6 + $0x128] sm:$0xff] }
  0x6f   : > { %2531 = vmatmul.mubr.msk.f32.gmra.mrb[6].mxu1 %vm310_vm0, %v3387_v28  ;;  %v1656_v63 = vld [vmem:[#allocation5 + $0xa0] sm:$0x1f] }
  0x70   : > { %2621 = vmatmul.mubr.msk.f32.gmra.mrb[6].mxu0 %vm310_vm0, %v3404_v31  ;;  %2533 = vmatprep.mubr.msk.f32.mxu1 %vm310_vm0, %v3392_v29  ;;  %v2355_v4 = vld [vmem:[%s3337_s6 + $0x140] sm:$0xff] }
  0x71   : > { %2641 = vmatprep.mubr.msk.f32.mxu0 %vm310_vm0, %v3408_v32 }
  0x73   : > { %2534 = vmatmul.mubr.msk.f32.gmra.mrb[8].mxu1 %vm310_vm0, %v3404_v31 }
  0x74   : > { %2642 = vmatmul.mubr.msk.f32.vlgmr.msra.gmra.mrb[0].mxu0 %vm310_vm0, %v3419_v33  ;;  %2536 = vmatprep.mubr.msk.f32.mxu1 %vm310_vm0, %v3422_v34 }
  0x75   : > { %2748 = vmatpush3.bf16.msra.mxu0 %v2745_v25  ;;  %2644 = vmatprep.mubr.msk.f32.mxu0 %vm310_vm0, %v3425_v35 }
  0x76   : > { %2669 = vmatprep.subr.msk.mxu0 %vm359_vm1, %v1423_v36 }
  0x77   : > { %2537 = vmatmul.mubr.msk.f32.gmra.mrb[10].mxu1 %vm310_vm0, %v3434_v39 }
  0x78   : > { %2645 = vmatmul.mubr.msk.f32.gmra.mrb[2].mxu0 %vm310_vm0, %v3439_v40  ;;  %2539 = vmatprep.mubr.msk.f32.mxu1 %vm310_vm0, %v3442_v41 }
  0x79   : > { %2647 = vmatprep.mubr.msk.f32.mxu0 %vm310_vm0, %v3445_v42  ;;  %2670 = vmatpush3.msk.msra.mxu0 %vm359_vm1, %v1423_v36 }
  0x7a   : > { %2750 = vmatprep.subr.bf16.mxu0 %v2749_v43 }
  0x7b   : > { %2540 = vmatmul.mubr.msk.f32.gmra.mrb[12].mxu1 %vm310_vm0, %v3455_v44 }
  0x7c   : > { %2648 = vmatmul.mubr.msk.f32.gmra.mrb[4].mxu0 %vm310_vm0, %v3460_v45  ;;  %2542 = vmatprep.mubr.msk.f32.mxu1 %vm310_vm0, %v3463_v46 }
  0x7d   : > { %2650 = vmatprep.mubr.msk.f32.mxu0 %vm310_vm0, %v3467_v47 }
  0x7f   : > { %2543 = vmatmul.mubr.msk.f32.gmra.mrb[14].mxu1 %vm310_vm0, %v3476_v48 }
  0x80   : > { %2651 = vmatmul.mubr.msk.f32.gmra.mrb[6].mxu0 %vm310_vm0, %v3481_v49  ;;  %2551 = vmatprep.mubr.msk.f32.mxu1 %vm310_vm0, %v270_v50 }
  0x81   : > { %2653 = vmatprep.mubr.msk.f32.mxu0 %vm310_vm0, %v3485_v51 }
  0x83   : > { %2552 = vmatmul.mubr.msk.f32.vlgmr.msra.gmra.mrb[0].mxu1 %vm310_vm0, %v271_v52 }
  0x84   : > { %2654 = vmatmul.mubr.msk.f32.gmra.mrb[8].mxu0 %vm310_vm0, %v3496_v53  ;;  %2736 = vmatpush3.bf16.msra.mxu1 %v2733_v30 }
  0x85   : > { %2554 = vmatprep.mubr.msk.f32.mxu1 %vm310_vm0, %v272_v54  ;;  %2656 = vmatprep.mubr.msk.f32.mxu0 %vm310_vm0, %v3500_v55 }
  0x86   : > { %2579 = vmatprep.subr.msk.mxu1 %vm359_vm1, %v724_v56 }
  0x87   : > { %2555 = vmatmul.mubr.msk.f32.gmra.mrb[2].mxu1 %vm310_vm0, %v273_v57 }
  0x88   : > { %2657 = vmatmul.mubr.msk.f32.gmra.mrb[10].mxu0 %vm310_vm0, %v3510_v58  ;;  %2557 = vmatprep.mubr.msk.f32.mxu1 %vm310_vm0, %v3408_v32 }
  0x89   : > { %2659 = vmatprep.mubr.msk.f32.mxu0 %vm310_vm0, %v3513_v59  ;;  %2580 = vmatpush3.msk.msra.mxu1 %vm359_vm1, %v724_v56 }
  0x8a   : > { %2753 = vmatprep.subr.bf16.mxu1 %v3347_v5 }
  0x8b   : > { %2558 = vmatmul.mubr.msk.f32.gmra.mrb[4].mxu1 %vm310_vm0, %v3419_v33 }
  0x8c   : > { %2660 = vmatmul.mubr.msk.f32.gmra.mrb[12].mxu0 %vm310_vm0, %v3524_v60  ;;  %2560 = vmatprep.mubr.msk.f32.mxu1 %vm310_vm0, %v3425_v35 }
  0x8d   : > { %2662 = vmatprep.mubr.msk.f32.mxu0 %vm310_vm0, %v3528_v61 }
  0x8f   : > { %2561 = vmatmul.mubr.msk.f32.gmra.mrb[6].mxu1 %vm310_vm0, %v3439_v40 }
  0x90   : > { %2663 = vmatmul.mubr.msk.f32.gmra.mrb[14].mxu0 %vm310_vm0, %v3540_v62  ;;  %2563 = vmatprep.mubr.msk.f32.mxu1 %vm310_vm0, %v3445_v42 }
  0x91   : > { %2671 = vmatprep.mubr.msk.f32.mxu0 %vm310_vm0, %v3368_v18 }
  0x93   : > { %2564 = vmatmul.mubr.msk.f32.gmra.mrb[8].mxu1 %vm310_vm0, %v3460_v45 }
  0x94   : > { %2672 = vmatmul.mubr.msk.f32.vlgmr.msra.gmra.mrb[0].mxu0 %vm310_vm0, %v3371_v21  ;;  %2566 = vmatprep.mubr.msk.f32.mxu1 %vm310_vm0, %v3467_v47 }
  0x95   : > { %2752 = vmatpush3.bf16.msra.mxu0 %v2749_v43  ;;  %2674 = vmatprep.mubr.msk.f32.mxu0 %vm310_vm0, %v3375_v22 }
  0x96   : > { %2699 = vmatprep.subr.msk.mxu0 %vm359_vm1, %v1656_v63 }
  0x97   : > { %2567 = vmatmul.mubr.msk.f32.gmra.mrb[10].mxu1 %vm310_vm0, %v3481_v49 }
  0x98   : > { %2675 = vmatmul.mubr.msk.f32.gmra.mrb[2].mxu0 %vm310_vm0, %v3387_v28  ;;  %2569 = vmatprep.mubr.msk.f32.mxu1 %vm310_vm0, %v3485_v51 }
  0x99   : > { %2677 = vmatprep.mubr.msk.f32.mxu0 %vm310_vm0, %v3392_v29  ;;  %2700 = vmatpush3.msk.msra.mxu0 %vm359_vm1, %v1656_v63 }
  0x9b   : > { %2570 = vmatmul.mubr.msk.f32.gmra.mrb[12].mxu1 %vm310_vm0, %v3496_v53 }
  0x9c   : > { %2678 = vmatmul.mubr.msk.f32.gmra.mrb[4].mxu0 %vm310_vm0, %v3404_v31  ;;  %2572 = vmatprep.mubr.msk.f32.mxu1 %vm310_vm0, %v3500_v55 }
  0x9d   : > { %2680 = vmatprep.mubr.msk.f32.mxu0 %vm310_vm0, %v3422_v34 }
  0x9f   : > { %2573 = vmatmul.mubr.msk.f32.gmra.mrb[14].mxu1 %vm310_vm0, %v3510_v58 }
  0xa0   : > { %2681 = vmatmul.mubr.msk.f32.gmra.mrb[6].mxu0 %vm310_vm0, %v3434_v39  ;;  %2581 = vmatprep.mubr.msk.f32.mxu1 %vm310_vm0, %v272_v54 }
  0xa1   : > { %2683 = vmatprep.mubr.msk.f32.mxu0 %vm310_vm0, %v3442_v41 }
  0xa3   : > { %2582 = vmatmul.mubr.msk.f32.vlgmr.msra.gmra.mrb[0].mxu1 %vm310_vm0, %v273_v57 }
  0xa4   : > { %2684 = vmatmul.mubr.msk.f32.gmra.mrb[8].mxu0 %vm310_vm0, %v3455_v44  ;;  %2755 = vmatpush3.bf16.msra.mxu1 %v3347_v5  ;;  %v2356_v5 = vld [vmem:[%s3337_s6 + $0x148] sm:$0xff] }
  0xa5   : > { %2584 = vmatprep.mubr.msk.f32.mxu1 %vm310_vm0, %v3408_v32  ;;  %2686 = vmatprep.mubr.msk.f32.mxu0 %vm310_vm0, %v3463_v46 }
  0xa6   : > { %2754 = vmatprep.subr.msk.mxu1 %vm359_vm1, %v3349_v7 }
  0xa7   : > { %2585 = vmatmul.mubr.msk.f32.gmra.mrb[2].mxu1 %vm310_vm0, %v3419_v33 }
  0xa8   : > { %2687 = vmatmul.mubr.msk.f32.gmra.mrb[10].mxu0 %vm310_vm0, %v3476_v48  ;;  %2587 = vmatprep.mubr.msk.f32.mxu1 %vm310_vm0, %v3425_v35 }
  0xa9   : > { %2689 = vmatprep.mubr.msk.f32.mxu0 %vm310_vm0, %v2320_v0  ;;  %2756 = vmatpush3.msk.msra.mxu1 %vm359_vm1, %v3349_v7 }
  0xab   : > { %2588 = vmatmul.mubr.msk.f32.gmra.mrb[4].mxu1 %vm310_vm0, %v3439_v40 }
  0xac   : > { %2690 = vmatmul.mubr.msk.f32.gmra.mrb[12].mxu0 %vm310_vm0, %v2321_v1  ;;  %2590 = vmatprep.mubr.msk.f32.mxu1 %vm310_vm0, %v3445_v42 }
  0xad   : > { %2692 = vmatprep.mubr.msk.f32.mxu0 %vm310_vm0, %v2322_v2 }
  0xaf   : > { %2591 = vmatmul.mubr.msk.f32.gmra.mrb[6].mxu1 %vm310_vm0, %v3460_v45 }
  0xb0   : > { %2693 = vmatmul.mubr.msk.f32.gmra.mrb[14].mxu0 %vm310_vm0, %v2323_v3  ;;  %2593 = vmatprep.mubr.msk.f32.mxu1 %vm310_vm0, %v3467_v47 }
  0xb1   : > { %2701 = vmatprep.mubr.msk.f32.mxu0 %vm310_vm0, %v3425_v35 }
  0xb3   : > { %2594 = vmatmul.mubr.msk.f32.gmra.mrb[8].mxu1 %vm310_vm0, %v3481_v49 }
  0xb4   : > { %2702 = vmatmul.mubr.msk.f32.vlgmr.msra.gmra.mrb[0].mxu0 %vm310_vm0, %v3439_v40  ;;  %2596 = vmatprep.mubr.msk.f32.mxu1 %vm310_vm0, %v3485_v51 }
  0xb5   : > { %2704 = vmatprep.mubr.msk.f32.mxu0 %vm310_vm0, %v3445_v42 }
  0xb7   : > { %2597 = vmatmul.mubr.msk.f32.gmra.mrb[10].mxu1 %vm310_vm0, %v3496_v53 }
  0xb8   : > { %2705 = vmatmul.mubr.msk.f32.gmra.mrb[2].mxu0 %vm310_vm0, %v3460_v45  ;;  %2599 = vmatprep.mubr.msk.f32.mxu1 %vm310_vm0, %v3500_v55 }
  0xb9   : > { %2707 = vmatprep.mubr.msk.f32.mxu0 %vm310_vm0, %v3467_v47 }
  0xbb   : > { %2600 = vmatmul.mubr.msk.f32.gmra.mrb[12].mxu1 %vm310_vm0, %v3510_v58 }
  0xbc   : > { %2708 = vmatmul.mubr.msk.f32.gmra.mrb[4].mxu0 %vm310_vm0, %v3481_v49  ;;  %2602 = vmatprep.mubr.msk.f32.mxu1 %vm310_vm0, %v3513_v59 }
  0xbd   : > { %2710 = vmatprep.mubr.msk.f32.mxu0 %vm310_vm0, %v3485_v51 }
  0xbf   : > { %2603 = vmatmul.mubr.msk.f32.gmra.mrb[14].mxu1 %vm310_vm0, %v3524_v60 }
  0xc0   : > { %2711 = vmatmul.mubr.msk.f32.gmra.mrb[6].mxu0 %vm310_vm0, %v3496_v53  ;;  %2623 = vmatprep.mubr.msk.f32.mxu1 %vm310_vm0, %v3422_v34 }
  0xc1   : > { %2713 = vmatprep.mubr.msk.f32.mxu0 %vm310_vm0, %v3500_v55 }
  0xc3   : > { %2624 = vmatmul.mubr.msk.f32.vlgmr.msra.gmra.mrb[8].mxu1 %vm310_vm0, %v3434_v39 }
  0xc4   : > { %2714 = vmatmul.mubr.msk.f32.gmra.mrb[8].mxu0 %vm310_vm0, %v3510_v58  ;;  %2626 = vmatprep.mubr.msk.f32.mxu1 %vm310_vm0, %v3442_v41 }
  0xc5   : > { %2716 = vmatprep.mubr.msk.f32.mxu0 %vm310_vm0, %v3513_v59 }
  0xc7   : > { %2627 = vmatmul.mubr.msk.f32.gmra.mrb[10].mxu1 %vm310_vm0, %v3455_v44 }
  0xc8   : > { %2717 = vmatmul.mubr.msk.f32.gmra.mrb[10].mxu0 %vm310_vm0, %v3524_v60  ;;  %2629 = vmatprep.mubr.msk.f32.mxu1 %vm310_vm0, %v3463_v46 }
  0xc9   : > { %2719 = vmatprep.mubr.msk.f32.mxu0 %vm310_vm0, %v3528_v61 }
  0xcb   : > { %2630 = vmatmul.mubr.msk.f32.gmra.mrb[12].mxu1 %vm310_vm0, %v3476_v48 }
  0xcc   : > { %2720 = vmatmul.mubr.msk.f32.gmra.mrb[12].mxu0 %vm310_vm0, %v3540_v62  ;;  %2632 = vmatprep.mubr.msk.f32.mxu1 %vm310_vm0, %v2320_v0 }
  0xcd   : > { %2722 = vmatprep.mubr.msk.f32.mxu0 %vm310_vm0, %v2355_v4 }
  0xcf   : > { %2633 = vmatmul.mubr.msk.f32.gmra.mrb[14].mxu1 %vm310_vm0, %v2321_v1 }
  0xd0   : > { %2723 = vmatmul.mubr.msk.f32.gmra.mrb[14].mxu0 %vm310_vm0, %v2356_v5 }
 0x176   : > { %v2583_v6 = vpop.f32.mrb[0].mxu1 }
 0x177   : > { %v842_v7 = vpop.f32.mrb[1].mxu1 }
 0x17a   : > { %v2586_v8 = vpop.f32.mrb[2].mxu1 }
 0x17b   : > { %v852_v9 = vpop.f32.mrb[3].mxu1 }
 0x17e   : > { %v2589_v10 = vpop.f32.mrb[4].mxu1 }
 0x17f   : > { %v862_v11 = vpop.f32.mrb[5].mxu1 }
 0x182   : > { %v2592_v12 = vpop.f32.mrb[6].mxu1 }
 0x183   : > { %v872_v13 = vpop.f32.mrb[7].mxu1 }
 0x187   : > { %v2703_v14 = vpop.f32.mrb[0].mxu0 }
 0x188   : > { %v2757_v15 = vadd.f32 %v2703_v14, %v2583_v6  ;;  %v1774_v16 = vpop.f32.mrb[1].mxu0 }
 0x189   : > { %v2758_v17 = vadd.f32 %v1774_v16, %v842_v7 }
 0x18a   : > { %1870 = vst [vmem:[%s3678_s23 + $0x8] sm:$0xff] %v2757_v15  ;;  %v1908_v18 = vmul.f32 %v2757_v15, %v2757_v15 }
 0x18b   : > { %1869 = vst [vmem:[%s3678_s23] sm:$0xff] %v2758_v17  ;;  %v1885_v19 = vadd.f32 %v2758_v17, %v2757_v15  ;;  %v1907_v20 = vmul.f32 %v2758_v17, %v2758_v17  ;;  %v2706_v21 = vpop.f32.mrb[2].mxu0 }
 0x18c   : > { %v2759_v22 = vadd.f32 %v2706_v21, %v2586_v8  ;;  %v1784_v23 = vpop.f32.mrb[3].mxu0 }
 0x18d   : > { %v1923_v24 = vadd.f32 %v1908_v18, %v1907_v20  ;;  %v2760_v25 = vadd.f32 %v1784_v23, %v852_v9 }
 0x18e   : > { %1872 = vst [vmem:[%s3678_s23 + $0x18] sm:$0xff] %v2759_v22  ;;  %v1910_v31 = vmul.f32 %v2759_v22, %v2759_v22 }
 0x18f   : > { %1871 = vst [vmem:[%s3678_s23 + $0x10] sm:$0xff] %v2760_v25  ;;  %v1886_v26 = vadd.f32 %v2760_v25, %v1885_v19  ;;  %v1909_v27 = vmul.f32 %v2760_v25, %v2760_v25  ;;  %v2709_v28 = vpop.f32.mrb[4].mxu0 }
 0x190   : > { %v2761_v29 = vadd.f32 %v2709_v28, %v2589_v10  ;;  %v1794_v30 = vpop.f32.mrb[5].mxu0 }
 0x191   : > { %v1924_v32 = vadd.f32 %v1923_v24, %v1909_v27  ;;  %v2762_v33 = vadd.f32 %v1794_v30, %v862_v11  ;;  %v1887_v34 = vadd.f32 %v2759_v22, %v1886_v26 }
 0x192   : > { %1874 = vst [vmem:[%s3678_s23 + $0x28] sm:$0xff] %v2761_v29  ;;  %v1912_v41 = vmul.f32 %v2761_v29, %v2761_v29 }
 0x193   : > { %1873 = vst [vmem:[%s3678_s23 + $0x20] sm:$0xff] %v2762_v33  ;;  %v1888_v35 = vadd.f32 %v2762_v33, %v1887_v34  ;;  %v1911_v36 = vmul.f32 %v2762_v33, %v2762_v33  ;;  %v1925_v37 = vadd.f32 %v1924_v32, %v1910_v31  ;;  %v2712_v38 = vpop.f32.mrb[6].mxu0 }
 0x194   : > { %v2763_v39 = vadd.f32 %v2712_v38, %v2592_v12  ;;  %v1804_v40 = vpop.f32.mrb[7].mxu0 }
 0x195   : > { %v1926_v42 = vadd.f32 %v1925_v37, %v1911_v36  ;;  %v2764_v43 = vadd.f32 %v1804_v40, %v872_v13  ;;  %v1889_v44 = vadd.f32 %v2761_v29, %v1888_v35 }
 0x196   : > { %1876 = vst [vmem:[%s3678_s23 + $0x38] sm:$0xff] %v2763_v39  ;;  %v2625_v45 = vpop.f32.mrb[8].mxu1  ;;  %v1914_v53 = vmul.f32 %v2763_v39, %v2763_v39 }
 0x197   : > { %1875 = vst [vmem:[%s3678_s23 + $0x30] sm:$0xff] %v2764_v43  ;;  %v1890_v46 = vadd.f32 %v2764_v43, %v1889_v44  ;;  %v1913_v47 = vmul.f32 %v2764_v43, %v2764_v43  ;;  %v1927_v48 = vadd.f32 %v1926_v42, %v1912_v41  ;;  %v2715_v49 = vpop.f32.mrb[8].mxu0  ;;  %v1115_v50 = vpop.f32.mrb[9].mxu1 }
 0x198   : > { %v2765_v51 = vadd.f32 %v2715_v49, %v2625_v45  ;;  %v1814_v52 = vpop.f32.mrb[9].mxu0 }
 0x199   : > { %v1928_v54 = vadd.f32 %v1927_v48, %v1913_v47  ;;  %v2766_v55 = vadd.f32 %v1814_v52, %v1115_v50  ;;  %v1891_v56 = vadd.f32 %v2763_v39, %v1890_v46 }
 0x19a   : > { %1878 = vst [vmem:[%s3678_s23 + $0x48] sm:$0xff] %v2765_v51  ;;  %v2628_v57 = vpop.f32.mrb[10].mxu1  ;;  %v1916_v1 = vmul.f32 %v2765_v51, %v2765_v51 }
 0x19b   : > { %1877 = vst [vmem:[%s3678_s23 + $0x40] sm:$0xff] %v2766_v55  ;;  %v1892_v58 = vadd.f32 %v2766_v55, %v1891_v56  ;;  %v1915_v59 = vmul.f32 %v2766_v55, %v2766_v55  ;;  %v1929_v60 = vadd.f32 %v1928_v54, %v1914_v53  ;;  %v2718_v61 = vpop.f32.mrb[10].mxu0  ;;  %v1125_v62 = vpop.f32.mrb[11].mxu1 }
 0x19c   : > { %v2767_v63 = vadd.f32 %v2718_v61, %v2628_v57  ;;  %v1824_v0 = vpop.f32.mrb[11].mxu0 }
 0x19d   : > { %v1930_v2 = vadd.f32 %v1929_v60, %v1915_v59  ;;  %v2768_v3 = vadd.f32 %v1824_v0, %v1125_v62  ;;  %v1893_v4 = vadd.f32 %v2765_v51, %v1892_v58 }
 0x19e   : > { %1880 = vst [vmem:[%s3678_s23 + $0x58] sm:$0xff] %v2767_v63  ;;  %v2631_v5 = vpop.f32.mrb[12].mxu1  ;;  %v1918_v13 = vmul.f32 %v2767_v63, %v2767_v63 }
 0x19f   : > { %1879 = vst [vmem:[%s3678_s23 + $0x50] sm:$0xff] %v2768_v3  ;;  %v1894_v6 = vadd.f32 %v2768_v3, %v1893_v4  ;;  %v1917_v7 = vmul.f32 %v2768_v3, %v2768_v3  ;;  %v1931_v8 = vadd.f32 %v1930_v2, %v1916_v1  ;;  %v2721_v9 = vpop.f32.mrb[12].mxu0  ;;  %v1135_v10 = vpop.f32.mrb[13].mxu1 }
 0x1a0   : > { %v2769_v11 = vadd.f32 %v2721_v9, %v2631_v5  ;;  %v1834_v12 = vpop.f32.mrb[13].mxu0 }
 0x1a1   : > { %v1932_v14 = vadd.f32 %v1931_v8, %v1917_v7  ;;  %v2770_v15 = vadd.f32 %v1834_v12, %v1135_v10  ;;  %v1895_v16 = vadd.f32 %v2767_v63, %v1894_v6 }
 0x1a2   : > { %1882 = vst [vmem:[%s3678_s23 + $0x68] sm:$0xff] %v2769_v11  ;;  %v2634_v17 = vpop.f32.mrb[14].mxu1  ;;  %v1920_v25 = vmul.f32 %v2769_v11, %v2769_v11 }
 0x1a3   : > { %1881 = vst [vmem:[%s3678_s23 + $0x60] sm:$0xff] %v2770_v15  ;;  %v1896_v18 = vadd.f32 %v2770_v15, %v1895_v16  ;;  %v1919_v19 = vmul.f32 %v2770_v15, %v2770_v15  ;;  %v1933_v20 = vadd.f32 %v1932_v14, %v1918_v13  ;;  %v2724_v21 = vpop.f32.mrb[14].mxu0  ;;  %v1145_v22 = vpop.f32.mrb[15].mxu1 }
 0x1a4   : > { %v2771_v23 = vadd.f32 %v2724_v21, %v2634_v17  ;;  %v1844_v24 = vpop.f32.mrb[15].mxu0 }
 0x1a5   : > { %v1934_v26 = vadd.f32 %v1933_v20, %v1919_v19  ;;  %v2772_v27 = vadd.f32 %v1844_v24, %v1145_v22  ;;  %v1897_v28 = vadd.f32 %v2769_v11, %v1896_v18 }
 0x1a6   : > { %1884 = vst [vmem:[%s3678_s23 + $0x78] sm:$0xff] %v2771_v23 }
 0x1a7   : > { %1883 = vst [vmem:[%s3678_s23 + $0x70] sm:$0xff] %v2772_v27  ;;  %v1898_v29 = vadd.f32 %v2772_v27, %v1897_v28  ;;  %v1921_v30 = vmul.f32 %v2772_v27, %v2772_v27  ;;  %v1935_v31 = vadd.f32 %v1934_v26, %v1920_v25 }
 0x1a8   : > { %3014 = shalt.err (!%p3011_p9)
}
 0x1a9   : > { %s3015_s26 = scalar_lea.hbm %s3699_s11, 2048  ;;  %s3019_s23 = scalar_lea.hbm %s3824_s2, 4096 }
 0x1aa   : > { %p3016_p1 = scmp.ne.s32.totalorder %s3699_s11, %s3015_s26  ;;  %p3020_p7 = scmp.lt.u32.totalorder %s3699_s11, %s3824_s2 }
 0x1ab   : > { %p3021_p11 = scmp.lt.u32.totalorder %s3019_s23, %s3015_s26  ;;  %p3023_p6 = scmp.lt.u32.totalorder %s3015_s26, %s3699_s11 }
 0x1ac   : > { %p3017_p2 = pnand %p3016_p1, %p3276_p10 }
 0x1ad   : > { %p3022_p4 = por %p3021_p11, %p3020_p7 }
 0x1ae   : > { %p3018_p3 = pneg %p3017_p2 }
 0x1af   : > { %p3024_p8 = por %p3023_p6, %p3022_p4 }
 0x1b1   : > { %p3025_p12 = pnand %p3024_p8, %p3018_p3 }
 0x1b3   : > { %3028 = shalt.err (!%p3025_p12)
}
 0x1b4   : > { %s3154_s10 = smov 128   ;;  %s3155_s7 = smov 8   ;;  %v1922_v32 = vmul.f32 %v2771_v23, %v2771_v23  ;;  %v1899_v33 = vadd.f32 %v2771_v23, %v1898_v29  ;;  %v1936_v34 = vadd.f32 %v1935_v31, %v1921_v30 }
 0x1b5   : > { %2862 = dma.vmem_to_hbm [thread:$0]  (%p3276_p10), %s3701_s12, 2048, %s3699_s11, %s1946_s30, %s3154_s10, %s3154_s10, %s3155_s7  }
 0x1b6   : > { %v1900_v35 = vrot.slane %v1899_v33, 4  ;;  %v1937_v36 = vadd.f32 %v1936_v34, %v1922_v32  ;;  %s1950_s9 = sand.u32 1, %s3214_s21   ;;  %s2377_s14 = sshll.u32 %s3139_s18, 4 }
 0x1b7   : > { %s262_s27 = scalar_lea.vmem [#allocation8], %s3333_s28  ;;  %s268_s12 = scalar_lea.vmem [#allocation10], %s3333_s28 }
 0x1b8   : > { %v1901_v37 = vadd.f32 %v1900_v35, %v1899_v33  ;;  %v1938_v38 = vrot.slane %v1937_v36, 4  ;;  %s1987_s26 = sshll.u32 %s262_s27, 4  ;;  %s2001_s11 = sshll.u32 %s268_s12, 4  ;;  %s3740_s26 = int_to_ptr.vmem [resolvable:$true] %s1987_s26  ;;  %s3747_s11 = int_to_ptr.vmem [resolvable:$true] %s2001_s11 }
 0x1b9   : > { %s3738_s22 = scalar_lea.hbm %s3825_s3, %s2377_s14  ;;  %s3745_s23 = scalar_lea.hbm %s3826_s4, %s2377_s14 }
 0x1ba   : > { %v1902_v39 = vrot.slane %v1901_v37, 2  ;;  %v1939_v40 = vadd.f32 %v1938_v38, %v1937_v36  ;;  %s3749_s25 = scalar_lea.sflag [#allocation9], %s1950_s9  ;;  %s3029_s13 = scalar_lea.vmem %s3740_s26, 16 }
 0x1bb   : > { %p3030_p13 = scmp.ne.s32.totalorder %s3740_s26, %s3029_s13  ;;  %s3156_s10 = smov [#allocation8]  }
 0x1bc   : > { %v1903_v41 = vadd.f32 %v1902_v39, %v1901_v37  ;;  %v1940_v42 = vrot.slane %v1939_v40, 2  ;;  %s3033_s7 = sshll.u32 %s3156_s10, 4  ;;  %s3034_s7 = int_to_ptr.vmem [resolvable:$false] %s3033_s7 }
 0x1bd   : > { %p3031_p0 = pnand %p3030_p13, %p3276_p10  ;;  %s3035_s30 = scalar_lea.vmem %s3034_s7, 32 }
 0x1be   : > { %v1941_v43 = vadd.f32 %v1940_v42, %v1939_v40  ;;  %v1904_v44 = vrot.slane %v1903_v41, 1  ;;  %p3036_p9 = scmp.lt.s32.totalorder %s3740_s26, %s3034_s7  ;;  %p3037_p1 = scmp.lt.s32.totalorder %s3035_s30, %s3029_s13 }
 0x1bf   : > { %p3032_p5 = pneg %p3031_p0 }
 0x1c0   : > { %v1905_v45 = vadd.f32 %v1904_v44, %v1903_v41  ;;  %v1942_v46 = vrot.slane %v1941_v43, 1  ;;  %p3038_p2 = por %p3037_p1, %p3036_p9 }
 0x1c2   : > { %1906 = vst [vmem:[%s262_s27] sm:$0x1] %v1905_v45  ;;  %v1943_v47 = vadd.f32 %v1942_v46, %v1941_v43  ;;  %p3039_p3 = pnand %p3038_p2, %p3032_p5 }
 0x1c4   : > { %3042 = shalt.err (!%p3039_p3)
}
 0x1c5   : > { %s3043_s9 = scalar_lea.hbm %s3738_s22, 16  ;;  %s3047_s6 = scalar_lea.hbm %s3825_s3, 32 }
 0x1c6   : > { %p3044_p7 = scmp.ne.s32.totalorder %s3738_s22, %s3043_s9  ;;  %p3048_p6 = scmp.lt.u32.totalorder %s3738_s22, %s3825_s3 }
 0x1c7   : > { %p3049_p8 = scmp.lt.u32.totalorder %s3047_s6, %s3043_s9  ;;  %p3051_p13 = scmp.lt.u32.totalorder %s3043_s9, %s3738_s22 }
 0x1c8   : > { %p3045_p11 = pnand %p3044_p7, %p3276_p10 }
 0x1c9   : > { %p3050_p12 = por %p3049_p8, %p3048_p6 }
 0x1ca   : > { %p3046_p4 = pneg %p3045_p11 }
 0x1cb   : > { %p3052_p0 = por %p3051_p13, %p3050_p12 }
 0x1cd   : > { %p3053_p5 = pnand %p3052_p0, %p3046_p4 }
 0x1cf   : > { %3056 = shalt.err (!%p3053_p5)
}
 0x1d0   : > { %2863 = dma.vmem_to_hbm [thread:$0]  (%p3276_p10), %s3740_s26, 16, %s3738_s22, %s3749_s25   ;;  %1944 = vst [vmem:[%s268_s12] sm:$0x1] %v1943_v47 }
 0x1d1   : > { %s3057_s13 = scalar_lea.vmem %s3747_s11, 16  ;;  %s3157_s10 = smov [#allocation10]  }
 0x1d2   : > { %p3058_p9 = scmp.ne.s32.totalorder %s3747_s11, %s3057_s13  ;;  %s3061_s7 = sshll.u32 %s3157_s10, 4  ;;  %s3062_s7 = int_to_ptr.vmem [resolvable:$false] %s3061_s7 }
 0x1d3   : > { %s3063_s30 = scalar_lea.vmem %s3062_s7, 32  ;;  %p3064_p3 = scmp.lt.s32.totalorder %s3747_s11, %s3062_s7 }
 0x1d4   : > { %p3059_p1 = pnand %p3058_p9, %p3276_p10  ;;  %p3065_p7 = scmp.lt.s32.totalorder %s3063_s30, %s3057_s13 }
 0x1d6   : > { %p3060_p2 = pneg %p3059_p1  ;;  %p3066_p11 = por %p3065_p7, %p3064_p3 }
 0x1d8   : > { %p3067_p4 = pnand %p3066_p11, %p3060_p2 }
 0x1da   : > { %3070 = shalt.err (!%p3067_p4)
}
 0x1db   : > { %s3071_s28 = scalar_lea.hbm %s3745_s23, 16  ;;  %s3075_s22 = scalar_lea.hbm %s3826_s4, 32 }
 0x1dc   : > { %p3072_p6 = scmp.ne.s32.totalorder %s3745_s23, %s3071_s28  ;;  %p3076_p13 = scmp.lt.u32.totalorder %s3745_s23, %s3826_s4 }
 0x1dd   : > { %p3077_p0 = scmp.lt.u32.totalorder %s3075_s22, %s3071_s28  ;;  %p3079_p9 = scmp.lt.u32.totalorder %s3071_s28, %s3745_s23 }
 0x1de   : > { %p3073_p8 = pnand %p3072_p6, %p3276_p10 }
 0x1df   : > { %p3078_p5 = por %p3077_p0, %p3076_p13 }
 0x1e0   : > { %p3074_p12 = pneg %p3073_p8 }
 0x1e1   : > { %p3080_p1 = por %p3079_p9, %p3078_p5 }
 0x1e3   : > { %p3081_p2 = pnand %p3080_p1, %p3074_p12 }
 0x1e5   : > { %3084 = shalt.err (!%p3081_p2)
}
 0x1e6   : > { %2864 = dma.vmem_to_hbm [thread:$0]  (%p3276_p10), %s3747_s11, 16, %s3745_s23, %s3749_s25  }
 0x1e7 PF: > { %s2013_s27 = sand.u32 1, %s3127_s15   ;;  %p3842_p3 = scmp.ne.s32.totalorder %s3832_s24, 0 }
 0x1e8   : > { %p3843_p7 = scmp.ge.s32.totalorder %s3147_s20, 2  ;;  %s2014_s6 = scalar_lea.sflag [#allocation4], %s2013_s27 }
 0x1ea   : > { %p2877_p11 = pnand %p3843_p7, %p3842_p3 }
 0x1ec   : > { %3118 = dma.done.wait (!%p2877_p11), %s2014_s6, 2048  }
 0x1ed   : > { %3120 = vsyncadd (!%p2877_p11), %s2014_s6, 4294965248  ;;  %s3844_s18 = sadd.s32 4294967294, %s3147_s20  }
 0x1ee   : > { %s2022_s21 = sand.u32 1, %s3844_s18  }
 0x1ef   : > { %s2023_s13 = scalar_lea.sflag [#allocation9], %s2022_s21 }
 0x1f0   : > { %3122 = dma.done.wait (!%p2877_p11), %s2023_s13, 32  }
 0x1f1   : > { %3124 = vsyncadd (!%p2877_p11), %s2023_s13, 4294967264  ;;  %s25_s20 = sadd.s32 1, %s3147_s20   ;;  %s3845_s15 = smov %s3131_s16 }
 0x1f2   : > { %p22_p10 = scmp.ge.s32.totalorder %s25_s20, 4   ;;  %s3846_s16 = smov %s3135_s17 }
 0x1f3   : > { %s3847_s17 = smov %s3285_s8  ;;  %s3848_s18 = smov %s3143_s19 }
 0x1f4   : > { %s3849_s19 = smov %s3851_s29  ;;  %24 = sbr.rel (!%p22_p10) target bundleno = 9 (0x9), region = 121 }
 0x1fb   :  { %2035 = vsyncpa [#allocation3], 1 }
 0x1fc   :  { %2037 = vsyncpa [#allocation3 + $0x1], 1 }
 0x1fd   :  { %2038 = vsyncpa [#allocation6], 1 }
 0x1fe   :  { %2039 = vsyncpa [#allocation4], 1 }
 0x1ff   :  { %2041 = vsyncpa [#allocation4 + $0x1], 1 }
 0x200   :  { %2042 = vsyncpa [#allocation9], 1 }
 0x201   :  { %2044 = vsyncpa [#allocation9 + $0x1], 1 }

</bundles_post_ra>
